<compile_context>
chip_gen: v7x
topology: tpu7x:2x2x1
jax: 0.10.0
libtpu: 0.0.40
codegen_flags: <defaults>
</compile_context>

<pallas_src>
import jax
import jax.numpy as jnp
from jax.experimental import pallas as pl
from jax.experimental.pallas import tpu as pltpu


_LEAKY_SLOPE = 0.01   # nn.LeakyReLU default
_BN_EPS = 1e-5        # nn.BatchNorm2d default


def _leaky(x):
    return jnp.where(x >= 0, x, _LEAKY_SLOPE * x)


def _mix(w, x):
    """Channel mix: w (Cin, Cout, 1) f32, x (Cin, TL) f32 -> (Cout, TL) f32.

    Small channel counts: unrolled outer-product accumulation on the VPU
    (avoids pushing a degenerate K=Cin, M=Cout matmul through the MXU).
    Large channel counts: MXU dot_general.
    """
    cin = w.shape[0]
    if cin <= 32:
        acc = w[0] * x[0:1, :]              # (Cout,1)*(1,TL) -> (Cout,TL)
        for i in range(1, cin):
            acc = acc + w[i] * x[i:i + 1, :]
        return acc
    return jax.lax.dot_general(w[:, :, 0], x, (((0,), (0,)), ((), ())),
                               preferred_element_type=jnp.float32)


def _spg_kernel(x_ref, w1_ref, b1_ref, w2_ref, b2_ref, w3_ref, b3_ref,
                w4_ref, b4_ref, w5_ref, b5_ref, o_ref):
    # x_ref / o_ref: (1, C, TL)  -- spatial on the lane axis.
    x = x_ref[0].astype(jnp.float32)                       # (C, TL)

    # ---- aux_pred: conv+BN(folded)+LeakyReLU x2, then conv(+bias) -----------
    h = _leaky(_mix(w1_ref[...], x) + b1_ref[...])         # (C,   TL)
    h = _leaky(_mix(w2_ref[...], h) + b2_ref[...])         # (C/2, TL)
    cp = _mix(w3_ref[...], h) + b3_ref[...]                # (ncls, TL) coarse_pred

    # ---- att: softmax over channels, conv+BN(folded), sigmoid ---------------
    m = jnp.max(cp, axis=0, keepdims=True)                 # (1, TL)
    e = jnp.exp(cp - m)                                    # EUP
    s = e / jnp.sum(e, axis=0, keepdims=True)              # (ncls, TL)
    z = _mix(w4_ref[...], s) + b4_ref[...]                 # (C, TL)
    att = 1.0 / (1.0 + jnp.exp(-z))                        # sigmoid (exp on EUP)

    # ---- gate + final conv+BN(folded)+LeakyReLU ------------------------------
    out = _leaky(_mix(w5_ref[...], x * att) + b5_ref[...])
    o_ref[0] = out.astype(o_ref.dtype)


def _fold_conv_bn(w, bn, eps=_BN_EPS):
    """Fold eval-mode BatchNorm into a bias-free 1x1 conv. Returns (Cout,Cin), (Cout,)."""
    gamma, beta, mean, var = bn
    scale = gamma / jnp.sqrt(var + eps)
    wf = w[:, :, 0, 0] * scale[:, None]
    bf = beta - mean * scale
    return wf, bf


def spg_forward(x_nchw, params, *, lane_tile=2048, bn_eps=_BN_EPS):
    """x_nchw: (N, C, H, W).  params: dict with w1..w5, bn1/2/4/5, b3 (see __main__)."""
    N, C, H, W = x_nchw.shape
    HW = H * W

    # Fold BN into the 1x1 convs (eval mode).
    w1f, b1f = _fold_conv_bn(params["w1"], params["bn1"], bn_eps)
    w2f, b2f = _fold_conv_bn(params["w2"], params["bn2"], bn_eps)
    w3f, b3f = params["w3"][:, :, 0, 0], params["b3"]
    w4f, b4f = _fold_conv_bn(params["w4"], params["bn4"], bn_eps)
    w5f, b5f = _fold_conv_bn(params["w5"], params["bn5"], bn_eps)
    ncls = w3f.shape[0]

    # Kernel-friendly weight packing: (Cin, Cout, 1) and biases (Cout, 1), f32.
    pk = lambda wm: jnp.transpose(wm).astype(jnp.float32)[:, :, None]
    pb = lambda bv: bv.astype(jnp.float32)[:, None]

    # NCHW -> (N, C, H*W): free reshape, spatial lands on the lane axis.
    x3 = x_nchw.reshape(N, C, HW)
    tl = min(lane_tile, ((HW + 127) // 128) * 128)      # lane tile, 128-multiple
    HWp = ((HW + tl - 1) // tl) * tl
    if HWp != HW:
        x3 = jnp.pad(x3, ((0, 0), (0, 0), (0, HWp - HW)))
    grid = (N, HWp // tl)

    def full_spec(shape):
        return pl.BlockSpec(shape, lambda n, j: (0,) * len(shape))

    in_specs = [pl.BlockSpec((1, C, tl), lambda n, j: (n, 0, j))]
    weight_args = []
    for wf, bf in ((w1f, b1f), (w2f, b2f), (w3f, b3f), (w4f, b4f), (w5f, b5f)):
        wk, bk = pk(wf), pb(bf)
        weight_args += [wk, bk]
        in_specs += [full_spec(wk.shape), full_spec(bk.shape)]

    itemsize = x_nchw.dtype.itemsize
    flops = 2 * N * HW * (2 * C * C + C * (C // 2) + (C // 2) * ncls + ncls * C) \
        + 12 * N * HW * C
    cost = pl.CostEstimate(
        flops=int(flops),
        transcendentals=int(N * HW * (ncls + C)),
        bytes_accessed=int(2 * N * C * HW * itemsize),
    )
    # Double-buffered in/out blocks + weights + f32 temps; keep well under the
    # v7x 64 MiB physical / 32 MiB default-scoped VMEM.
    blk_bytes = C * tl * itemsize
    vmem_limit = int(min(max(16 * blk_bytes + (2 << 20), 4 << 20), 32 << 20))

    out3 = pl.pallas_call(
        _spg_kernel,
        out_shape=jax.ShapeDtypeStruct((N, C, HWp), x_nchw.dtype),
        grid_spec=pltpu.PrefetchScalarGridSpec(
            num_scalar_prefetch=0,
            grid=grid,
            in_specs=in_specs,
            out_specs=pl.BlockSpec((1, C, tl), lambda n, j: (n, 0, j)),
        ),
        compiler_params=pltpu.CompilerParams(
            dimension_semantics=("parallel", "parallel"),
            vmem_limit_bytes=vmem_limit,
        ),
        cost_estimate=cost,
    )(x3, *weight_args)

    return out3[:, :, :HW].reshape(N, C, H, W)


# ----------------------------- pure-JAX reference -----------------------------

def _conv1x1_ref(x, w, b=None):
    y = jnp.einsum('nchw,oc->nohw', x, w[:, :, 0, 0])
    if b is not None:
        y = y + b[None, :, None, None]
    return y


def _bn_ref(x, bn, eps=_BN_EPS):
    gamma, beta, mean, var = bn
    inv = gamma / jnp.sqrt(var + eps)
    return (x - mean[None, :, None, None]) * inv[None, :, None, None] \
        + beta[None, :, None, None]


def spg_reference(x, params, eps=_BN_EPS):
    lrelu = lambda t: jnp.where(t >= 0, t, _LEAKY_SLOPE * t)
    h = lrelu(_bn_ref(_conv1x1_ref(x, params["w1"]), params["bn1"], eps))
    h = lrelu(_bn_ref(_conv1x1_ref(h, params["w2"]), params["bn2"], eps))
    cp = _conv1x1_ref(h, params["w3"], params["b3"])
    s = jax.nn.softmax(cp, axis=1)
    att = jax.nn.sigmoid(_bn_ref(_conv1x1_ref(s, params["w4"]), params["bn4"], eps))
    out = lrelu(_bn_ref(_conv1x1_ref(x * att, params["w5"]), params["bn5"], eps))
    return out


if __name__ == "__main__":
    # Small shapes consistent with the module: batch=2, in_channels=4, nclass=4, 16x16.
    N, C, H, W = 2, 4, 16, 16
    ncls = 4

    key = jax.random.PRNGKey(0)
    keys = jax.random.split(key, 12)

    def uconv(k, cout, cin):
        bound = 1.0 / (cin ** 0.5)
        return jax.random.uniform(k, (cout, cin, 1, 1),
                                  minval=-bound, maxval=bound, dtype=jnp.float32)

    def bn_params(k, c):
        k1, k2, k3, k4 = jax.random.split(k, 4)
        gamma = 1.0 + 0.1 * jax.random.normal(k1, (c,), jnp.float32)
        beta = 0.1 * jax.random.normal(k2, (c,), jnp.float32)
        mean = 0.1 * jax.random.normal(k3, (c,), jnp.float32)
        var = jnp.abs(jax.random.normal(k4, (c,), jnp.float32)) + 0.5
        return (gamma, beta, mean, var)

    x = jax.random.normal(keys[0], (N, C, H, W), dtype=jnp.float32)
    params = {
        "w1": uconv(keys[1], C, C),        "bn1": bn_params(keys[2], C),
        "w2": uconv(keys[3], C // 2, C),   "bn2": bn_params(keys[4], C // 2),
        "w3": uconv(keys[5], ncls, C // 2),
        "b3": 0.1 * jax.random.normal(keys[6], (ncls,), jnp.float32),
        "w4": uconv(keys[7], C, ncls),     "bn4": bn_params(keys[8], C),
        "w5": uconv(keys[9], C, C),        "bn5": bn_params(keys[10], C),
    }

    out = jax.block_until_ready(spg_forward(x, params))
    ref = spg_reference(x, params)

    assert out.shape == (N, C, H, W)
    err = float(jnp.max(jnp.abs(out - ref)))
    # f32 compute with folded BN; tolerance covers Mosaic-vs-XLA transcendental diffs.
    assert jnp.allclose(out, ref, atol=2e-4, rtol=2e-4), f"max abs err = {err}"

    print("KERNEL_OK")
</pallas_src>

<mosaic_0001>
module attributes {stable_mosaic.version = 11 : i64} {
  func.func @_spg_kernel(%arg0: i32, %arg1: i32, %arg2: memref<1x4x256xf32, #tpu.memory_space<vmem>>, %arg3: memref<4x4x1xf32, #tpu.memory_space<vmem>>, %arg4: memref<4x1xf32, #tpu.memory_space<vmem>>, %arg5: memref<4x2x1xf32, #tpu.memory_space<vmem>>, %arg6: memref<2x1xf32, #tpu.memory_space<vmem>>, %arg7: memref<2x4x1xf32, #tpu.memory_space<vmem>>, %arg8: memref<4x1xf32, #tpu.memory_space<vmem>>, %arg9: memref<4x4x1xf32, #tpu.memory_space<vmem>>, %arg10: memref<4x1xf32, #tpu.memory_space<vmem>>, %arg11: memref<4x4x1xf32, #tpu.memory_space<vmem>>, %arg12: memref<4x1xf32, #tpu.memory_space<vmem>>, %arg13: memref<1x4x256xf32, #tpu.memory_space<vmem>>) attributes {dimension_semantics = [#tpu.dimension_semantics<parallel>, #tpu.dimension_semantics<parallel>], iteration_bounds = array<i64: 2, 1>, scalar_prefetch = 0 : i64, scratch_operands = 0 : i64, tpu.core_type = #tpu.core_type<tc>, window_params = [{transform_indices = @transform_0, window_bounds = array<i64: 1, 4, 256>}, {pipeline_mode = #tpu.pipeline_mode<synchronous>, transform_indices = @transform_1, window_bounds = array<i64: 4, 4, 1>}, {pipeline_mode = #tpu.pipeline_mode<synchronous>, transform_indices = @transform_2, window_bounds = array<i64: 4, 1>}, {pipeline_mode = #tpu.pipeline_mode<synchronous>, transform_indices = @transform_3, window_bounds = array<i64: 4, 2, 1>}, {pipeline_mode = #tpu.pipeline_mode<synchronous>, transform_indices = @transform_4, window_bounds = array<i64: 2, 1>}, {pipeline_mode = #tpu.pipeline_mode<synchronous>, transform_indices = @transform_5, window_bounds = array<i64: 2, 4, 1>}, {pipeline_mode = #tpu.pipeline_mode<synchronous>, transform_indices = @transform_6, window_bounds = array<i64: 4, 1>}, {pipeline_mode = #tpu.pipeline_mode<synchronous>, transform_indices = @transform_7, window_bounds = array<i64: 4, 4, 1>}, {pipeline_mode = #tpu.pipeline_mode<synchronous>, transform_indices = @transform_8, window_bounds = array<i64: 4, 1>}, {pipeline_mode = #tpu.pipeline_mode<synchronous>, transform_indices = @transform_9, window_bounds = array<i64: 4, 4, 1>}, {pipeline_mode = #tpu.pipeline_mode<synchronous>, transform_indices = @transform_10, window_bounds = array<i64: 4, 1>}, {transform_indices = @transform_11, window_bounds = array<i64: 1, 4, 256>}]} {
    %c0 = arith.constant 0 : index
    %c0_0 = arith.constant 0 : index
    %c0_1 = arith.constant 0 : index
    %0 = vector.load %arg2[%c0, %c0_0, %c0_1] : memref<1x4x256xf32, #tpu.memory_space<vmem>>, vector<1x4x256xf32>
    %1 = vector.shape_cast %0 : vector<1x4x256xf32> to vector<4x256xf32>
    %c0_2 = arith.constant 0 : index
    %c0_3 = arith.constant 0 : index
    %c0_4 = arith.constant 0 : index
    %2 = vector.load %arg3[%c0_2, %c0_3, %c0_4] : memref<4x4x1xf32, #tpu.memory_space<vmem>>, vector<4x4x1xf32>
    %3 = vector.extract_strided_slice %2 {offsets = [0, 0, 0], sizes = [1, 4, 1], strides = [1, 1, 1]} : vector<4x4x1xf32> to vector<1x4x1xf32>
    %4 = vector.shape_cast %3 : vector<1x4x1xf32> to vector<4x1xf32>
    %5 = vector.extract_strided_slice %1 {offsets = [0, 0], sizes = [1, 256], strides = [1, 1]} : vector<4x256xf32> to vector<1x256xf32>
    %6 = vector.broadcast %4 : vector<4x1xf32> to vector<4x256xf32>
    %7 = vector.broadcast %5 : vector<1x256xf32> to vector<4x256xf32>
    %8 = arith.mulf %6, %7 : vector<4x256xf32>
    %9 = vector.extract_strided_slice %2 {offsets = [1, 0, 0], sizes = [1, 4, 1], strides = [1, 1, 1]} : vector<4x4x1xf32> to vector<1x4x1xf32>
    %10 = vector.shape_cast %9 : vector<1x4x1xf32> to vector<4x1xf32>
    %11 = vector.extract_strided_slice %1 {offsets = [1, 0], sizes = [1, 256], strides = [1, 1]} : vector<4x256xf32> to vector<1x256xf32>
    %12 = vector.broadcast %10 : vector<4x1xf32> to vector<4x256xf32>
    %13 = vector.broadcast %11 : vector<1x256xf32> to vector<4x256xf32>
    %14 = arith.mulf %12, %13 : vector<4x256xf32>
    %15 = arith.addf %8, %14 : vector<4x256xf32>
    %16 = vector.extract_strided_slice %2 {offsets = [2, 0, 0], sizes = [1, 4, 1], strides = [1, 1, 1]} : vector<4x4x1xf32> to vector<1x4x1xf32>
    %17 = vector.shape_cast %16 : vector<1x4x1xf32> to vector<4x1xf32>
    %18 = vector.extract_strided_slice %1 {offsets = [2, 0], sizes = [1, 256], strides = [1, 1]} : vector<4x256xf32> to vector<1x256xf32>
    %19 = vector.broadcast %17 : vector<4x1xf32> to vector<4x256xf32>
    %20 = vector.broadcast %18 : vector<1x256xf32> to vector<4x256xf32>
    %21 = arith.mulf %19, %20 : vector<4x256xf32>
    %22 = arith.addf %15, %21 : vector<4x256xf32>
    %23 = vector.extract_strided_slice %2 {offsets = [3, 0, 0], sizes = [1, 4, 1], strides = [1, 1, 1]} : vector<4x4x1xf32> to vector<1x4x1xf32>
    %24 = vector.shape_cast %23 : vector<1x4x1xf32> to vector<4x1xf32>
    %25 = vector.extract_strided_slice %1 {offsets = [3, 0], sizes = [1, 256], strides = [1, 1]} : vector<4x256xf32> to vector<1x256xf32>
    %26 = vector.broadcast %24 : vector<4x1xf32> to vector<4x256xf32>
    %27 = vector.broadcast %25 : vector<1x256xf32> to vector<4x256xf32>
    %28 = arith.mulf %26, %27 : vector<4x256xf32>
    %29 = arith.addf %22, %28 : vector<4x256xf32>
    %c0_5 = arith.constant 0 : index
    %c0_6 = arith.constant 0 : index
    %30 = vector.load %arg4[%c0_5, %c0_6] : memref<4x1xf32, #tpu.memory_space<vmem>>, vector<4x1xf32>
    %31 = vector.broadcast %30 : vector<4x1xf32> to vector<4x256xf32>
    %32 = arith.addf %29, %31 : vector<4x256xf32>
    %cst = arith.constant 0.000000e+00 : f32
    %33 = vector.broadcast %cst : f32 to vector<4x256xf32>
    %34 = arith.cmpf oge, %32, %33 : vector<4x256xf32>
    %cst_7 = arith.constant 0.00999999977 : f32
    %35 = vector.broadcast %cst_7 : f32 to vector<4x256xf32>
    %36 = arith.mulf %35, %32 : vector<4x256xf32>
    %37 = arith.select %34, %32, %36 : vector<4x256xi1>, vector<4x256xf32>
    %c0_8 = arith.constant 0 : index
    %c0_9 = arith.constant 0 : index
    %c0_10 = arith.constant 0 : index
    %38 = vector.load %arg5[%c0_8, %c0_9, %c0_10] : memref<4x2x1xf32, #tpu.memory_space<vmem>>, vector<4x2x1xf32>
    %39 = vector.extract_strided_slice %38 {offsets = [0, 0, 0], sizes = [1, 2, 1], strides = [1, 1, 1]} : vector<4x2x1xf32> to vector<1x2x1xf32>
    %40 = vector.shape_cast %39 : vector<1x2x1xf32> to vector<2x1xf32>
    %41 = vector.extract_strided_slice %37 {offsets = [0, 0], sizes = [1, 256], strides = [1, 1]} : vector<4x256xf32> to vector<1x256xf32>
    %42 = vector.broadcast %40 : vector<2x1xf32> to vector<2x256xf32>
    %43 = vector.broadcast %41 : vector<1x256xf32> to vector<2x256xf32>
    %44 = arith.mulf %42, %43 : vector<2x256xf32>
    %45 = vector.extract_strided_slice %38 {offsets = [1, 0, 0], sizes = [1, 2, 1], strides = [1, 1, 1]} : vector<4x2x1xf32> to vector<1x2x1xf32>
    %46 = vector.shape_cast %45 : vector<1x2x1xf32> to vector<2x1xf32>
    %47 = vector.extract_strided_slice %37 {offsets = [1, 0], sizes = [1, 256], strides = [1, 1]} : vector<4x256xf32> to vector<1x256xf32>
    %48 = vector.broadcast %46 : vector<2x1xf32> to vector<2x256xf32>
    %49 = vector.broadcast %47 : vector<1x256xf32> to vector<2x256xf32>
    %50 = arith.mulf %48, %49 : vector<2x256xf32>
    %51 = arith.addf %44, %50 : vector<2x256xf32>
    %52 = vector.extract_strided_slice %38 {offsets = [2, 0, 0], sizes = [1, 2, 1], strides = [1, 1, 1]} : vector<4x2x1xf32> to vector<1x2x1xf32>
    %53 = vector.shape_cast %52 : vector<1x2x1xf32> to vector<2x1xf32>
    %54 = vector.extract_strided_slice %37 {offsets = [2, 0], sizes = [1, 256], strides = [1, 1]} : vector<4x256xf32> to vector<1x256xf32>
    %55 = vector.broadcast %53 : vector<2x1xf32> to vector<2x256xf32>
    %56 = vector.broadcast %54 : vector<1x256xf32> to vector<2x256xf32>
    %57 = arith.mulf %55, %56 : vector<2x256xf32>
    %58 = arith.addf %51, %57 : vector<2x256xf32>
    %59 = vector.extract_strided_slice %38 {offsets = [3, 0, 0], sizes = [1, 2, 1], strides = [1, 1, 1]} : vector<4x2x1xf32> to vector<1x2x1xf32>
    %60 = vector.shape_cast %59 : vector<1x2x1xf32> to vector<2x1xf32>
    %61 = vector.extract_strided_slice %37 {offsets = [3, 0], sizes = [1, 256], strides = [1, 1]} : vector<4x256xf32> to vector<1x256xf32>
    %62 = vector.broadcast %60 : vector<2x1xf32> to vector<2x256xf32>
    %63 = vector.broadcast %61 : vector<1x256xf32> to vector<2x256xf32>
    %64 = arith.mulf %62, %63 : vector<2x256xf32>
    %65 = arith.addf %58, %64 : vector<2x256xf32>
    %c0_11 = arith.constant 0 : index
    %c0_12 = arith.constant 0 : index
    %66 = vector.load %arg6[%c0_11, %c0_12] : memref<2x1xf32, #tpu.memory_space<vmem>>, vector<2x1xf32>
    %67 = vector.broadcast %66 : vector<2x1xf32> to vector<2x256xf32>
    %68 = arith.addf %65, %67 : vector<2x256xf32>
    %cst_13 = arith.constant 0.000000e+00 : f32
    %69 = vector.broadcast %cst_13 : f32 to vector<2x256xf32>
    %70 = arith.cmpf oge, %68, %69 : vector<2x256xf32>
    %cst_14 = arith.constant 0.00999999977 : f32
    %71 = vector.broadcast %cst_14 : f32 to vector<2x256xf32>
    %72 = arith.mulf %71, %68 : vector<2x256xf32>
    %73 = arith.select %70, %68, %72 : vector<2x256xi1>, vector<2x256xf32>
    %c0_15 = arith.constant 0 : index
    %c0_16 = arith.constant 0 : index
    %c0_17 = arith.constant 0 : index
    %74 = vector.load %arg7[%c0_15, %c0_16, %c0_17] : memref<2x4x1xf32, #tpu.memory_space<vmem>>, vector<2x4x1xf32>
    %75 = vector.extract_strided_slice %74 {offsets = [0, 0, 0], sizes = [1, 4, 1], strides = [1, 1, 1]} : vector<2x4x1xf32> to vector<1x4x1xf32>
    %76 = vector.shape_cast %75 : vector<1x4x1xf32> to vector<4x1xf32>
    %77 = vector.extract_strided_slice %73 {offsets = [0, 0], sizes = [1, 256], strides = [1, 1]} : vector<2x256xf32> to vector<1x256xf32>
    %78 = vector.broadcast %76 : vector<4x1xf32> to vector<4x256xf32>
    %79 = vector.broadcast %77 : vector<1x256xf32> to vector<4x256xf32>
    %80 = arith.mulf %78, %79 : vector<4x256xf32>
    %81 = vector.extract_strided_slice %74 {offsets = [1, 0, 0], sizes = [1, 4, 1], strides = [1, 1, 1]} : vector<2x4x1xf32> to vector<1x4x1xf32>
    %82 = vector.shape_cast %81 : vector<1x4x1xf32> to vector<4x1xf32>
    %83 = vector.extract_strided_slice %73 {offsets = [1, 0], sizes = [1, 256], strides = [1, 1]} : vector<2x256xf32> to vector<1x256xf32>
    %84 = vector.broadcast %82 : vector<4x1xf32> to vector<4x256xf32>
    %85 = vector.broadcast %83 : vector<1x256xf32> to vector<4x256xf32>
    %86 = arith.mulf %84, %85 : vector<4x256xf32>
    %87 = arith.addf %80, %86 : vector<4x256xf32>
    %c0_18 = arith.constant 0 : index
    %c0_19 = arith.constant 0 : index
    %88 = vector.load %arg8[%c0_18, %c0_19] : memref<4x1xf32, #tpu.memory_space<vmem>>, vector<4x1xf32>
    %89 = vector.broadcast %88 : vector<4x1xf32> to vector<4x256xf32>
    %90 = arith.addf %87, %89 : vector<4x256xf32>
    %cst_20 = arith.constant dense<0xFF800000> : vector<256xf32>
    %91 = vector.multi_reduction <maximumf>, %90, %cst_20 [0] : vector<4x256xf32> to vector<256xf32>
    %92 = vector.shape_cast %91 : vector<256xf32> to vector<1x256xf32>
    %93 = vector.broadcast %92 : vector<1x256xf32> to vector<4x256xf32>
    %94 = arith.subf %90, %93 : vector<4x256xf32>
    %95 = math.exp %94 : vector<4x256xf32>
    %cst_21 = arith.constant dense<0.000000e+00> : vector<256xf32>
    %96 = vector.multi_reduction <add>, %95, %cst_21 [0] : vector<4x256xf32> to vector<256xf32>
    %97 = vector.shape_cast %96 : vector<256xf32> to vector<1x256xf32>
    %98 = vector.broadcast %97 : vector<1x256xf32> to vector<4x256xf32>
    %99 = arith.divf %95, %98 : vector<4x256xf32>
    %c0_22 = arith.constant 0 : index
    %c0_23 = arith.constant 0 : index
    %c0_24 = arith.constant 0 : index
    %100 = vector.load %arg9[%c0_22, %c0_23, %c0_24] : memref<4x4x1xf32, #tpu.memory_space<vmem>>, vector<4x4x1xf32>
    %101 = vector.extract_strided_slice %100 {offsets = [0, 0, 0], sizes = [1, 4, 1], strides = [1, 1, 1]} : vector<4x4x1xf32> to vector<1x4x1xf32>
    %102 = vector.shape_cast %101 : vector<1x4x1xf32> to vector<4x1xf32>
    %103 = vector.extract_strided_slice %99 {offsets = [0, 0], sizes = [1, 256], strides = [1, 1]} : vector<4x256xf32> to vector<1x256xf32>
    %104 = vector.broadcast %102 : vector<4x1xf32> to vector<4x256xf32>
    %105 = vector.broadcast %103 : vector<1x256xf32> to vector<4x256xf32>
    %106 = arith.mulf %104, %105 : vector<4x256xf32>
    %107 = vector.extract_strided_slice %100 {offsets = [1, 0, 0], sizes = [1, 4, 1], strides = [1, 1, 1]} : vector<4x4x1xf32> to vector<1x4x1xf32>
    %108 = vector.shape_cast %107 : vector<1x4x1xf32> to vector<4x1xf32>
    %109 = vector.extract_strided_slice %99 {offsets = [1, 0], sizes = [1, 256], strides = [1, 1]} : vector<4x256xf32> to vector<1x256xf32>
    %110 = vector.broadcast %108 : vector<4x1xf32> to vector<4x256xf32>
    %111 = vector.broadcast %109 : vector<1x256xf32> to vector<4x256xf32>
    %112 = arith.mulf %110, %111 : vector<4x256xf32>
    %113 = arith.addf %106, %112 : vector<4x256xf32>
    %114 = vector.extract_strided_slice %100 {offsets = [2, 0, 0], sizes = [1, 4, 1], strides = [1, 1, 1]} : vector<4x4x1xf32> to vector<1x4x1xf32>
    %115 = vector.shape_cast %114 : vector<1x4x1xf32> to vector<4x1xf32>
    %116 = vector.extract_strided_slice %99 {offsets = [2, 0], sizes = [1, 256], strides = [1, 1]} : vector<4x256xf32> to vector<1x256xf32>
    %117 = vector.broadcast %115 : vector<4x1xf32> to vector<4x256xf32>
    %118 = vector.broadcast %116 : vector<1x256xf32> to vector<4x256xf32>
    %119 = arith.mulf %117, %118 : vector<4x256xf32>
    %120 = arith.addf %113, %119 : vector<4x256xf32>
    %121 = vector.extract_strided_slice %100 {offsets = [3, 0, 0], sizes = [1, 4, 1], strides = [1, 1, 1]} : vector<4x4x1xf32> to vector<1x4x1xf32>
    %122 = vector.shape_cast %121 : vector<1x4x1xf32> to vector<4x1xf32>
    %123 = vector.extract_strided_slice %99 {offsets = [3, 0], sizes = [1, 256], strides = [1, 1]} : vector<4x256xf32> to vector<1x256xf32>
    %124 = vector.broadcast %122 : vector<4x1xf32> to vector<4x256xf32>
    %125 = vector.broadcast %123 : vector<1x256xf32> to vector<4x256xf32>
    %126 = arith.mulf %124, %125 : vector<4x256xf32>
    %127 = arith.addf %120, %126 : vector<4x256xf32>
    %c0_25 = arith.constant 0 : index
    %c0_26 = arith.constant 0 : index
    %128 = vector.load %arg10[%c0_25, %c0_26] : memref<4x1xf32, #tpu.memory_space<vmem>>, vector<4x1xf32>
    %129 = vector.broadcast %128 : vector<4x1xf32> to vector<4x256xf32>
    %130 = arith.addf %127, %129 : vector<4x256xf32>
    %cst_27 = arith.constant 0.000000e+00 : f32
    %131 = vector.broadcast %cst_27 : f32 to vector<4x256xf32>
    %132 = arith.subf %131, %130 : vector<4x256xf32>
    %133 = math.exp %132 : vector<4x256xf32>
    %cst_28 = arith.constant 1.000000e+00 : f32
    %134 = vector.broadcast %cst_28 : f32 to vector<4x256xf32>
    %135 = arith.addf %134, %133 : vector<4x256xf32>
    %cst_29 = arith.constant 1.000000e+00 : f32
    %136 = vector.broadcast %cst_29 : f32 to vector<4x256xf32>
    %137 = arith.divf %136, %135 : vector<4x256xf32>
    %c0_30 = arith.constant 0 : index
    %c0_31 = arith.constant 0 : index
    %c0_32 = arith.constant 0 : index
    %138 = vector.load %arg11[%c0_30, %c0_31, %c0_32] : memref<4x4x1xf32, #tpu.memory_space<vmem>>, vector<4x4x1xf32>
    %139 = arith.mulf %1, %137 : vector<4x256xf32>
    %140 = vector.extract_strided_slice %138 {offsets = [0, 0, 0], sizes = [1, 4, 1], strides = [1, 1, 1]} : vector<4x4x1xf32> to vector<1x4x1xf32>
    %141 = vector.shape_cast %140 : vector<1x4x1xf32> to vector<4x1xf32>
    %142 = vector.extract_strided_slice %139 {offsets = [0, 0], sizes = [1, 256], strides = [1, 1]} : vector<4x256xf32> to vector<1x256xf32>
    %143 = vector.broadcast %141 : vector<4x1xf32> to vector<4x256xf32>
    %144 = vector.broadcast %142 : vector<1x256xf32> to vector<4x256xf32>
    %145 = arith.mulf %143, %144 : vector<4x256xf32>
    %146 = vector.extract_strided_slice %138 {offsets = [1, 0, 0], sizes = [1, 4, 1], strides = [1, 1, 1]} : vector<4x4x1xf32> to vector<1x4x1xf32>
    %147 = vector.shape_cast %146 : vector<1x4x1xf32> to vector<4x1xf32>
    %148 = vector.extract_strided_slice %139 {offsets = [1, 0], sizes = [1, 256], strides = [1, 1]} : vector<4x256xf32> to vector<1x256xf32>
    %149 = vector.broadcast %147 : vector<4x1xf32> to vector<4x256xf32>
    %150 = vector.broadcast %148 : vector<1x256xf32> to vector<4x256xf32>
    %151 = arith.mulf %149, %150 : vector<4x256xf32>
    %152 = arith.addf %145, %151 : vector<4x256xf32>
    %153 = vector.extract_strided_slice %138 {offsets = [2, 0, 0], sizes = [1, 4, 1], strides = [1, 1, 1]} : vector<4x4x1xf32> to vector<1x4x1xf32>
    %154 = vector.shape_cast %153 : vector<1x4x1xf32> to vector<4x1xf32>
    %155 = vector.extract_strided_slice %139 {offsets = [2, 0], sizes = [1, 256], strides = [1, 1]} : vector<4x256xf32> to vector<1x256xf32>
    %156 = vector.broadcast %154 : vector<4x1xf32> to vector<4x256xf32>
    %157 = vector.broadcast %155 : vector<1x256xf32> to vector<4x256xf32>
    %158 = arith.mulf %156, %157 : vector<4x256xf32>
    %159 = arith.addf %152, %158 : vector<4x256xf32>
    %160 = vector.extract_strided_slice %138 {offsets = [3, 0, 0], sizes = [1, 4, 1], strides = [1, 1, 1]} : vector<4x4x1xf32> to vector<1x4x1xf32>
    %161 = vector.shape_cast %160 : vector<1x4x1xf32> to vector<4x1xf32>
    %162 = vector.extract_strided_slice %139 {offsets = [3, 0], sizes = [1, 256], strides = [1, 1]} : vector<4x256xf32> to vector<1x256xf32>
    %163 = vector.broadcast %161 : vector<4x1xf32> to vector<4x256xf32>
    %164 = vector.broadcast %162 : vector<1x256xf32> to vector<4x256xf32>
    %165 = arith.mulf %163, %164 : vector<4x256xf32>
    %166 = arith.addf %159, %165 : vector<4x256xf32>
    %c0_33 = arith.constant 0 : index
    %c0_34 = arith.constant 0 : index
    %167 = vector.load %arg12[%c0_33, %c0_34] : memref<4x1xf32, #tpu.memory_space<vmem>>, vector<4x1xf32>
    %168 = vector.broadcast %167 : vector<4x1xf32> to vector<4x256xf32>
    %169 = arith.addf %166, %168 : vector<4x256xf32>
    %cst_35 = arith.constant 0.000000e+00 : f32
    %170 = vector.broadcast %cst_35 : f32 to vector<4x256xf32>
    %171 = arith.cmpf oge, %169, %170 : vector<4x256xf32>
    %cst_36 = arith.constant 0.00999999977 : f32
    %172 = vector.broadcast %cst_36 : f32 to vector<4x256xf32>
    %173 = arith.mulf %172, %169 : vector<4x256xf32>
    %174 = arith.select %171, %169, %173 : vector<4x256xi1>, vector<4x256xf32>
    %c0_37 = arith.constant 0 : index
    %c0_38 = arith.constant 0 : index
    %c0_39 = arith.constant 0 : index
    %175 = vector.load %arg13[%c0_37, %c0_38, %c0_39] : memref<1x4x256xf32, #tpu.memory_space<vmem>>, vector<1x4x256xf32>
    %176 = vector.shape_cast %175 : vector<1x4x256xf32> to vector<4x256xf32>
    %177 = vector.shape_cast %174 : vector<4x256xf32> to vector<1x4x256xf32>
    tpu.vector_store %arg13[%c0_37, %c0_38, %c0_39], %177 {strides = array<i32>} : memref<1x4x256xf32, #tpu.memory_space<vmem>>, vector<1x4x256xf32>,
    return
  }
  func.func @transform_0(%arg0: i32, %arg1: i32) -> (i32, i32, i32) {
    %c0_i32 = arith.constant 0 : i32
    %c0_i32_0 = arith.constant 0 : i32
    return %arg0, %c0_i32, %arg1 : i32, i32, i32
  }
  func.func @transform_1(%arg0: i32, %arg1: i32) -> (i32, i32, i32) {
    %c0_i32 = arith.constant 0 : i32
    %c0_i32_0 = arith.constant 0 : i32
    %c0_i32_1 = arith.constant 0 : i32
    %c0_i32_2 = arith.constant 0 : i32
    return %c0_i32, %c0_i32_0, %c0_i32_1 : i32, i32, i32
  }
  func.func @transform_2(%arg0: i32, %arg1: i32) -> (i32, i32) {
    %c0_i32 = arith.constant 0 : i32
    %c0_i32_0 = arith.constant 0 : i32
    %c0_i32_1 = arith.constant 0 : i32
    return %c0_i32, %c0_i32_0 : i32, i32
  }
  func.func @transform_3(%arg0: i32, %arg1: i32) -> (i32, i32, i32) {
    %c0_i32 = arith.constant 0 : i32
    %c0_i32_0 = arith.constant 0 : i32
    %c0_i32_1 = arith.constant 0 : i32
    %c0_i32_2 = arith.constant 0 : i32
    return %c0_i32, %c0_i32_0, %c0_i32_1 : i32, i32, i32
  }
  func.func @transform_4(%arg0: i32, %arg1: i32) -> (i32, i32) {
    %c0_i32 = arith.constant 0 : i32
    %c0_i32_0 = arith.constant 0 : i32
    %c0_i32_1 = arith.constant 0 : i32
    return %c0_i32, %c0_i32_0 : i32, i32
  }
  func.func @transform_5(%arg0: i32, %arg1: i32) -> (i32, i32, i32) {
    %c0_i32 = arith.constant 0 : i32
    %c0_i32_0 = arith.constant 0 : i32
    %c0_i32_1 = arith.constant 0 : i32
    %c0_i32_2 = arith.constant 0 : i32
    return %c0_i32, %c0_i32_0, %c0_i32_1 : i32, i32, i32
  }
  func.func @transform_6(%arg0: i32, %arg1: i32) -> (i32, i32) {
    %c0_i32 = arith.constant 0 : i32
    %c0_i32_0 = arith.constant 0 : i32
    %c0_i32_1 = arith.constant 0 : i32
    return %c0_i32, %c0_i32_0 : i32, i32
  }
  func.func @transform_7(%arg0: i32, %arg1: i32) -> (i32, i32, i32) {
    %c0_i32 = arith.constant 0 : i32
    %c0_i32_0 = arith.constant 0 : i32
    %c0_i32_1 = arith.constant 0 : i32
    %c0_i32_2 = arith.constant 0 : i32
    return %c0_i32, %c0_i32_0, %c0_i32_1 : i32, i32, i32
  }
  func.func @transform_8(%arg0: i32, %arg1: i32) -> (i32, i32) {
    %c0_i32 = arith.constant 0 : i32
    %c0_i32_0 = arith.constant 0 : i32
    %c0_i32_1 = arith.constant 0 : i32
    return %c0_i32, %c0_i32_0 : i32, i32
  }
  func.func @transform_9(%arg0: i32, %arg1: i32) -> (i32, i32, i32) {
    %c0_i32 = arith.constant 0 : i32
    %c0_i32_0 = arith.constant 0 : i32
    %c0_i32_1 = arith.constant 0 : i32
    %c0_i32_2 = arith.constant 0 : i32
    return %c0_i32, %c0_i32_0, %c0_i32_1 : i32, i32, i32
  }
  func.func @transform_10(%arg0: i32, %arg1: i32) -> (i32, i32) {
    %c0_i32 = arith.constant 0 : i32
    %c0_i32_0 = arith.constant 0 : i32
    %c0_i32_1 = arith.constant 0 : i32
    return %c0_i32, %c0_i32_0 : i32, i32
  }
  func.func @transform_11(%arg0: i32, %arg1: i32) -> (i32, i32, i32) {
    %c0_i32 = arith.constant 0 : i32
    %c0_i32_0 = arith.constant 0 : i32
    return %arg0, %c0_i32, %arg1 : i32, i32, i32
  }
}

</mosaic_0001>

<bundles_post_ra>
// kernel: tpu_custom_call.1
= control target key start
LH: loop header
LB: loop body
LE: loop exit
PB: predicated region body
PF: predicated region fallthrough
CT: control target
= control target key end

     0   :  { %s1534_s0 = inlined_call_operand.vmem [shape: f32[2,4,256], index: 0, kind: input, shape index: {}]   ;;  %s1535_s1 = inlined_call_operand.vmem [shape: f32[4,4,1], index: 1, kind: input, shape index: {}]   ;;  %s1536_s2 = inlined_call_operand.vmem [shape: f32[4,1], index: 2, kind: input, shape index: {}]   ;;  %s1537_s3 = inlined_call_operand.vmem [shape: f32[4,2,1], index: 3, kind: input, shape index: {}]   ;;  %s1538_s4 = inlined_call_operand.vmem [shape: f32[2,1], index: 4, kind: input, shape index: {}]   ;;  %s1539_s5 = inlined_call_operand.vmem [shape: f32[2,4,1], index: 5, kind: input, shape index: {}]   ;;  %s1540_s6 = inlined_call_operand.vmem [shape: f32[4,1], index: 6, kind: input, shape index: {}]   ;;  %s1541_s7 = inlined_call_operand.vmem [shape: f32[4,4,1], index: 7, kind: input, shape index: {}]   ;;  %s1542_s8 = inlined_call_operand.vmem [shape: f32[4,1], index: 8, kind: input, shape index: {}]   ;;  %s1543_s9 = inlined_call_operand.vmem [shape: f32[4,4,1], index: 9, kind: input, shape index: {}]   ;;  %s1544_s10 = inlined_call_operand.vmem [shape: f32[4,1], index: 10, kind: input, shape index: {}]   ;;  %s1545_s11 = inlined_call_operand.hbm [shape: f32[2,4,256], index: 11, kind: output, shape index: {}]  }
   0x1   :  { %1547 = sst [smem:[#allocation6_spill]] %s1534_s0 }
   0x2   :  { %16 = vsyncpa [#allocation3], 0 }
   0x3   :  { %18 = vsyncpa [#allocation3 + $0x1], 0  ;;  %s1256_s17 = smov 0   ;;  %s1258_s18 = smov 0  }
   0x4   :  { %s1260_s19 = smov 0   ;;  %s1262_s20 = smov 0  }
   0x5   :  { %s1264_s21 = smov 0   ;;  %s1266_s22 = smov 0  }
   0x6 LB: > { %s1025_s23 = sadd.s32 4294967295, %s1192_s22   ;;  %s1026_s24 = sadd.s32 4294967294, %s1192_s22   ;;  %s1192_s22 = sphi %s1266_s22, %s24_s22   ;;  %s1188_s21 = sphi %s1264_s21, %s1557_s21   ;;  %s1184_s20 = sphi %s1262_s20, %s1556_s20   ;;  %s1180_s19 = sphi %s1260_s19, %s1555_s19   ;;  %s1176_s18 = sphi %s1258_s18, %s1554_s18   ;;  %s1172_s17 = sphi %s1256_s17, %s1553_s17  }
   0x7   : > { %s36_s25 = sadd.s32 1, %s1188_s21  ;;  %s283_s26 = sadd.s32 1, %s1180_s19 }
   0x8   : > { %p38_p0 = scmp.ge.s32.totalorder %s36_s25, 2  ;;  %p293_p1 = scmp.ne.s32.totalorder %s1180_s19, %s1176_s18 }
   0x9   : > { %p294_p2 = scmp.eq.s32.totalorder %s1025_s23, 1  ;;  %p299_p3 = scmp.ne.s32.totalorder %s1176_s18, %s1172_s17 }
   0xa   : > { %s1559_s25 = smov (%p38_p0, %s36_s25), 0  ;;  %p300_p5 = scmp.eq.s32.totalorder %s1026_s24, 1 }
   0xb   : > { %1548 = sst [smem:[#allocation5_spill]] %s1559_s25  ;;  %p1296_p4 = por %p294_p2, %p293_p1 }
   0xc   : > { %s278_s28 = ssub.s32 %s1188_s21, %s1559_s25  ;;  %p1029_p6 = scmp.ge.s32.totalorder %s1192_s22, 1 }
   0xd   : > { %p281_p7 = scmp.eq.s32.totalorder %s278_s28, 0  ;;  %p1303_p8 = por %p300_p5, %p299_p3 }
   0xe   : > { %p361_p9 = scmp.lt.s32.totalorder %s1192_s22, 3 }
   0xf   : > { %s1309_s30 = scalar_select %p281_p7, %s1180_s19, %s283_s26  }
  0x10   : > { %p362_p10 = pnand %p1029_p6, %p361_p9 }
  0x11   : > { %v419_v0 = vld [vmem:[%s1535_s1 + $0x8] sm:$0xf] (!%p362_p10)  ;;  %v417_v1 = vld [vmem:[%s1535_s1] sm:$0xf] (!%p362_p10)  ;;  %v1194_v2 = vmov (!%p362_p10), 0   ;;  %p406_p11 = scmp.lt.s32.totalorder (!%p362_p10), %s1184_s20, 1  ;;  %v427_v24 = vlaneseq (!%p362_p10) }
  0x12   : > { %365 = sbr.rel (%p362_p10) target bundleno = 320 (0x140), region = 64  ;;  %1097 = vset.pattern.permute.xlu1 (!%p362_p10), %v1194_v2  ;;  %1096 = vset.pattern.permute.xlu0 (!%p362_p10), %v1194_v2  ;;  %v420_v3 = vld [vmem:[%s1535_s1 + $0xc] sm:$0xf] (!%p362_p10)  ;;  %v418_v4 = vld [vmem:[%s1535_s1 + $0x4] sm:$0xf] (!%p362_p10)  ;;  %s1551_s0 = sld [smem:[#allocation6_spill]] (!%p362_p10) }
  0x13   : > { %476 = vperm.xlu1 (!%p362_p10), %1097, %v419_v0   ;;  %423 = vperm.xlu0 (!%p362_p10), %1096, %v417_v1   ;;  %v542_v5 = vld [vmem:[%s1537_s3] sm:$0x3] (!%p362_p10)  ;;  %v544_v7 = vld [vmem:[%s1537_s3 + $0x4] sm:$0x3] (!%p362_p10)  ;;  %v543_v8 = vld [vmem:[%s1537_s3 + $0x2] sm:$0x3] (!%p362_p10) }
  0x14   : > { %v528_v6 = vld [vmem:[%s1536_s2] sm:$0xf] (!%p362_p10)  ;;  %v545_v10 = vld [vmem:[%s1537_s3 + $0x6] sm:$0x3] (!%p362_p10)  ;;  %v709_v15 = vld [vmem:[%s1541_s7 + $0x8] sm:$0xf] (!%p362_p10) }
  0x15   : > { %v612_v9 = vld [vmem:[%s1538_s4] sm:$0x3] (!%p362_p10)  ;;  %v627_v11 = vld [vmem:[%s1539_s5 + $0x4] sm:$0xf] (!%p362_p10)  ;;  %v710_v18 = vld [vmem:[%s1541_s7 + $0xc] sm:$0xf] (!%p362_p10) }
  0x16   : > { %v626_v12 = vld [vmem:[%s1539_s5] sm:$0xf] (!%p362_p10)  ;;  %v708_v16 = vld [vmem:[%s1541_s7 + $0x4] sm:$0xf] (!%p362_p10)  ;;  %v800_v21 = vld [vmem:[%s1543_s9 + $0xc] sm:$0xf] (!%p362_p10) }
  0x17   : > { %503 = vperm.xlu1 (!%p362_p10), %1097, %v420_v3   ;;  %449 = vperm.xlu0 (!%p362_p10), %1096, %v418_v4   ;;  %v707_v13 = vld [vmem:[%s1541_s7] sm:$0xf] (!%p362_p10)  ;;  %v798_v19 = vld [vmem:[%s1543_s9 + $0x4] sm:$0xf] (!%p362_p10)  ;;  %v799_v22 = vld [vmem:[%s1543_s9 + $0x8] sm:$0xf] (!%p362_p10) }
  0x18   : > { %v660_v14 = vld [vmem:[%s1540_s6] sm:$0xf] (!%p362_p10)  ;;  %v1382_v25 = vshrl.u32 (!%p362_p10), %v427_v24, 7  ;;  %vm668_vm4 = vcmask (!%p362_p10), 1043456   ;;  %s402_s14 = sand.u32 (!%p362_p10), 1, %s1176_s18   ;;  %s1039_s15 = sshll.u32 (!%p362_p10), %s1184_s20, 7 }
  0x19   : > { %v777_v17 = vld [vmem:[%s1542_s8] sm:$0xf]  ;;  %s407_s24 = scalar_select %p406_p11, %s1184_s20, 1 }
  0x1a   : > { %v797_v20 = vld [vmem:[%s1543_s9] sm:$0xf]  ;;  %v1388_v26 = vsub.s32 0, %v1382_v25  ;;  %v433_v27 = vsub.s32 4, %v1382_v25  ;;  %v1392_v28 = vsub.s32 1, %v1382_v25  ;;  %v458_v29 = vsub.s32 5, %v1382_v25  ;;  %s1485_s28 = scalar_lea.hbm %s1545_s11, %s1039_s15 }
  0x1b   : > { %548 = vperm.xlu1 %1097, %v542_v5   ;;  %531 = vperm.xlu0 %1096, %v528_v6   ;;  %v913_v23 = vld [vmem:[%s1544_s10] sm:$0xf]  ;;  %s1038_s26 = sshll.u32 %s407_s24, 3  ;;  %v1398_v31 = vsub.s32 2, %v1382_v25  ;;  %v485_v32 = vsub.s32 6, %v1382_v25  ;;  %v1402_v33 = vsub.s32 3, %v1382_v25 }
  0x1c   : > { %s413_s13 = scalar_lea.vmem %s1551_s0, %s1038_s26  ;;  %v512_v34 = vsub.s32 7, %v1382_v25  ;;  %s1030_s25 = sshll.u32 %s402_s14, 3 }
  0x1d   : > { %v1395_v30 = vld [vmem:[%s413_s13] sm:$0xff]  ;;  %s404_s16 = scalar_lea.vmem [#allocation2], %s1030_s25  ;;  %s933_s20 = scalar_lea.sflag [#allocation3], %s402_s14 }
  0x1e   : > { %v430_v35 = vrot.slane %v1395_v30, %v1388_v26  ;;  %v434_v36 = vrot.slane %v1395_v30, %v433_v27  ;;  %v455_v37 = vrot.slane %v1395_v30, %v1392_v28  ;;  %v459_v38 = vrot.slane %v1395_v30, %v458_v29  ;;  %s949_s23 = sshll.u32 %s404_s16, 4  ;;  %s1195_s13 = smov [#allocation2]   ;;  %s1487_s23 = int_to_ptr.vmem [resolvable:$true] %s949_s23 }
  0x1f   : > { %580 = vperm.xlu1 %1097, %v544_v7   ;;  %563 = vperm.xlu0 %1096, %v543_v8   ;;  %v482_v39 = vrot.slane %v1395_v30, %v1398_v31  ;;  %v486_v40 = vrot.slane %v1395_v30, %v485_v32  ;;  %v509_v43 = vrot.slane %v1395_v30, %v1402_v33  ;;  %s1114_s12 = scalar_lea.vmem %s1487_s23, 128  ;;  %s1118_s25 = sshll.u32 %s1195_s13, 4  ;;  %s1119_s25 = int_to_ptr.vmem [resolvable:$false] %s1118_s25 }
  0x20   : > { %v513_v44 = vrot.slane %v1395_v30, %v512_v34  ;;  %v440_v45 = vrot.slane %v430_v35, %v1388_v26  ;;  %v444_v46 = vrot.slane %v434_v36, %v1388_v26  ;;  %v465_v47 = vrot.slane %v455_v37, %v1392_v28  ;;  %p1115_p12 = scmp.ne.s32.totalorder %s1487_s23, %s1114_s12  ;;  %s1120_s0 = scalar_lea.vmem %s1119_s25, 256 }
  0x21   : > { %v469_v48 = vrot.slane %v459_v38, %v1392_v28  ;;  %v492_v49 = vrot.slane %v482_v39, %v1398_v31  ;;  %v496_v50 = vrot.slane %v486_v40, %v1398_v31  ;;  %v519_v51 = vrot.slane %v509_v43, %v1402_v33  ;;  %p1121_p1 = scmp.lt.s32.totalorder %s1487_s23, %s1119_s25  ;;  %p1122_p2 = scmp.lt.s32.totalorder %s1120_s0, %s1114_s12 }
  0x22   : > { %v523_v52 = vrot.slane %v513_v44, %v1402_v33  ;;  %p1116_p13 = pnand %p1115_p12, %p1296_p4 }
  0x23   : > { %615 = vperm.xlu1 %1097, %v612_v9   ;;  %597 = vperm.xlu0 %1096, %v545_v10   ;;  %p1123_p3 = por %p1122_p2, %p1121_p1 }
  0x24   : > { %p1117_p0 = pneg %p1116_p13 }
  0x26   : > { %p1124_p5 = pnand %p1123_p3, %p1117_p0 }
  0x27   : > { %645 = vperm.xlu1 %1097, %v627_v11   ;;  %630 = vperm.xlu0 %1096, %v626_v12  }
  0x2b   : > { %713 = vperm.xlu1 %1097, %v707_v13   ;;  %663 = vperm.xlu0 %1096, %v660_v14  }
  0x2f   : > { %745 = vperm.xlu1 %1097, %v709_v15   ;;  %728 = vperm.xlu0 %1096, %v708_v16  }
  0x33   : > { %780 = vperm.xlu1 %1097, %v777_v17   ;;  %762 = vperm.xlu0 %1096, %v710_v18  }
  0x37   : > { %834 = vperm.xlu1 %1097, %v798_v19   ;;  %808 = vperm.xlu0 %1096, %v797_v20  }
  0x3b   : > { %888 = vperm.xlu1 %1097, %v800_v21   ;;  %861 = vperm.xlu0 %1096, %v799_v22  }
  0x3f   : > { %916 = vperm.xlu0 %1096, %v913_v23  }
  0x92   : > { %v477_v41 = vpop.permute.xlu1 %476  ;;  %v424_v42 = vpop.permute.xlu0 %423 }
  0x93   : > { %v445_v54 = vmul.f32 %v440_v45, %v424_v42  ;;  %v446_v55 = vmul.f32 %v444_v46, %v424_v42  ;;  %v497_v59 = vmul.f32 %v492_v49, %v477_v41  ;;  %v498_v60 = vmul.f32 %v496_v50, %v477_v41 }
  0x96   : > { %v450_v53 = vpop.permute.xlu0 %449  ;;  %v504_v58 = vpop.permute.xlu1 %503 }
  0x97   : > { %v470_v56 = vmul.f32 %v465_v47, %v450_v53  ;;  %v471_v57 = vmul.f32 %v469_v48, %v450_v53  ;;  %v524_v63 = vmul.f32 %v519_v51, %v504_v58  ;;  %v525_v0 = vmul.f32 %v523_v52, %v504_v58 }
  0x99   : > { %v472_v61 = vadd.f32 %v470_v56, %v445_v54  ;;  %v473_v62 = vadd.f32 %v471_v57, %v446_v55 }
  0x9a   : > { %v532_v5 = vpop.permute.xlu0 %531  ;;  %v549_v10 = vpop.permute.xlu1 %548 }
  0x9b   : > { %v499_v1 = vadd.f32 %v497_v59, %v472_v61  ;;  %v500_v2 = vadd.f32 %v498_v60, %v473_v62 }
  0x9d   : > { %v526_v3 = vadd.f32 %v524_v63, %v499_v1  ;;  %v527_v4 = vadd.f32 %v525_v0, %v500_v2 }
  0x9e   : > { %v564_v13 = vpop.permute.xlu0 %563  ;;  %v581_v36 = vpop.permute.xlu1 %580 }
  0x9f   : > { %v534_v6 = vadd.f32 %v532_v5, %v526_v3  ;;  %v535_v7 = vadd.f32 %v532_v5, %v527_v4 }
  0xa1   : > { %vm536_vm0 = vcmp.ge.f32.partialorder %v534_v6, 0.0  ;;  %vm537_vm1 = vcmp.ge.f32.partialorder %v535_v7, 0.0  ;;  %v538_v8 = vmul.f32 0.01, %v534_v6  ;;  %v539_v9 = vmul.f32 0.01, %v535_v7 }
  0xa2   : > { %v598_v41 = vpop.permute.xlu0 %597  ;;  %v616_v48 = vpop.permute.xlu1 %615 }
  0xa3   : > { %v540_v11 = vsel %vm536_vm0, %v534_v6, %v538_v8  ;;  %v541_v12 = vsel %vm537_vm1, %v535_v7, %v539_v9 }
  0xa4   : > { %v554_v14 = vrot.slane %v540_v11, %v1388_v26  ;;  %v558_v15 = vrot.slane %v541_v12, %v1388_v26  ;;  %v586_v16 = vrot.slane %v540_v11, %v1398_v31  ;;  %v590_v17 = vrot.slane %v541_v12, %v1398_v31 }
  0xa5   : > { %v569_v18 = vrot.slane %v540_v11, %v1392_v28  ;;  %v573_v19 = vrot.slane %v541_v12, %v1392_v28  ;;  %v603_v24 = vrot.slane %v540_v11, %v1402_v33  ;;  %v607_v35 = vrot.slane %v541_v12, %v1402_v33 }
  0xa6   : > { %v559_v20 = vmul.f32 %v554_v14, %v549_v10  ;;  %v560_v21 = vmul.f32 %v558_v15, %v549_v10  ;;  %v591_v37 = vmul.f32 %v586_v16, %v581_v36  ;;  %v592_v38 = vmul.f32 %v590_v17, %v581_v36  ;;  %v631_v55 = vpop.permute.xlu0 %630  ;;  %v646_v60 = vpop.permute.xlu1 %645 }
  0xa7   : > { %v574_v22 = vmul.f32 %v569_v18, %v564_v13  ;;  %v575_v23 = vmul.f32 %v573_v19, %v564_v13  ;;  %v608_v44 = vmul.f32 %v603_v24, %v598_v41  ;;  %v609_v45 = vmul.f32 %v607_v35, %v598_v41 }
  0xa9   : > { %v576_v39 = vadd.f32 %v574_v22, %v559_v20  ;;  %v577_v40 = vadd.f32 %v575_v23, %v560_v21 }
  0xaa   : > { %v664_v3 = vpop.permute.xlu0 %663 }
  0xab   : > { %v593_v42 = vadd.f32 %v591_v37, %v576_v39  ;;  %v594_v43 = vadd.f32 %v592_v38, %v577_v40 }
  0xad   : > { %v610_v46 = vadd.f32 %v608_v44, %v593_v42  ;;  %v611_v47 = vadd.f32 %v609_v45, %v594_v43 }
  0xaf   : > { %v618_v49 = vadd.f32 %v616_v48, %v610_v46  ;;  %v619_v50 = vadd.f32 %v616_v48, %v611_v47 }
  0xb1   : > { %vm620_vm2 = vcmp.ge.f32.partialorder %v618_v49, 0.0  ;;  %vm621_vm3 = vcmp.ge.f32.partialorder %v619_v50, 0.0  ;;  %v622_v51 = vmul.f32 0.01, %v618_v49  ;;  %v623_v52 = vmul.f32 0.01, %v619_v50 }
  0xb3   : > { %v624_v53 = vsel %vm620_vm2, %v618_v49, %v622_v51  ;;  %v625_v54 = vsel %vm621_vm3, %v619_v50, %v623_v52  ;;  %v714_v51 = vpop.permute.xlu1 %713 }
  0xb4   : > { %v651_v56 = vrot.slane %v624_v53, %v1392_v28  ;;  %v655_v57 = vrot.slane %v625_v54, %v1392_v28  ;;  %v636_v58 = vrot.slane %v624_v53, %v1388_v26  ;;  %v640_v59 = vrot.slane %v625_v54, %v1388_v26 }
  0xb6   : > { %v656_v61 = vmul.f32 %v651_v56, %v646_v60  ;;  %v657_v62 = vmul.f32 %v655_v57, %v646_v60  ;;  %v641_v63 = vmul.f32 %v636_v58, %v631_v55  ;;  %v642_v0 = vmul.f32 %v640_v59, %v631_v55  ;;  %v729_v55 = vpop.permute.xlu0 %728 }
  0xb8   : > { %v658_v1 = vadd.f32 %v656_v61, %v641_v63  ;;  %v659_v2 = vadd.f32 %v657_v62, %v642_v0 }
  0xba   : > { %v666_v4 = vadd.f32 %v664_v3, %v658_v1  ;;  %v667_v5 = vadd.f32 %v664_v3, %v659_v2  ;;  %v746_v1 = vpop.permute.xlu1 %745 }
  0xbc   : > { %v669_v6 = vsel %vm668_vm4, %v666_v4, -inf  ;;  %v676_v7 = vsel %vm668_vm4, %v667_v5, -inf }
  0xbd   : > { %v670_v8 = vrot.slane %v669_v6, 4  ;;  %v677_v9 = vrot.slane %v676_v7, 4 }
  0xbf   : > { %v671_v10 = vmax.f32 %v669_v6, %v670_v8  ;;  %v678_v11 = vmax.f32 %v676_v7, %v677_v9  ;;  %v763_v9 = vpop.permute.xlu0 %762 }
  0xc1   : > { %v672_v12 = vrot.slane %v671_v10, 2  ;;  %v679_v13 = vrot.slane %v678_v11, 2 }
  0xc3   : > { %v673_v14 = vmax.f32 %v671_v10, %v672_v12  ;;  %v680_v15 = vmax.f32 %v678_v11, %v679_v13 }
  0xc5   : > { %v674_v16 = vrot.slane %v673_v14, 1  ;;  %v681_v17 = vrot.slane %v680_v15, 1 }
  0xc7   : > { %v675_v18 = vmax.f32 %v673_v14, %v674_v16  ;;  %v682_v19 = vmax.f32 %v680_v15, %v681_v17  ;;  %v781_v15 = vpop.permute.xlu1 %780 }
  0xc9   : > { %v683_v20 = vsub.f32 %v666_v4, %v675_v18  ;;  %v684_v21 = vsub.f32 %v667_v5, %v682_v19 }
  0xcb   : > { %v685_v22 = vmul.f32 1.442695, %v683_v20  ;;  %v687_v23 = vmul.f32 1.442695, %v684_v21 }
  0xcd   : > { %1098 = vpow2.f32 %v685_v22 }
  0xce   : > { %1100 = vpow2.f32 %v687_v23 }
  0xd7   : > { %v1099_v24 = vpop.eup %1098 }
  0xd8   : > { %v1101_v35 = vpop.eup %1100  ;;  %v689_v36 = vsel %vm668_vm4, %v1099_v24, 0.0 }
  0xd9   : > { %v690_v37 = vrot.slane %v689_v36, 4  ;;  %v696_v38 = vsel %vm668_vm4, %v1101_v35, 0.0 }
  0xda   : > { %v697_v39 = vrot.slane %v696_v38, 4 }
  0xdb   : > { %v691_v40 = vadd.f32 %v690_v37, %v689_v36 }
  0xdc   : > { %v698_v41 = vadd.f32 %v697_v39, %v696_v38 }
  0xdd   : > { %v692_v42 = vrot.slane %v691_v40, 2 }
  0xde   : > { %v699_v43 = vrot.slane %v698_v41, 2 }
  0xdf   : > { %v693_v44 = vadd.f32 %v692_v42, %v691_v40 }
  0xe0   : > { %v700_v45 = vadd.f32 %v699_v43, %v698_v41  ;;  %v809_v41 = vpop.permute.xlu0 %808 }
  0xe1   : > { %v694_v46 = vrot.slane %v693_v44, 1 }
  0xe2   : > { %v701_v47 = vrot.slane %v700_v45, 1 }
  0xe3   : > { %v695_v48 = vadd.f32 %v694_v46, %v693_v44  ;;  %v835_v46 = vpop.permute.xlu1 %834 }
  0xe4   : > { %v702_v49 = vadd.f32 %v701_v47, %v700_v45 }
  0xe5   : > { %1102 = vrcp.f32 %v695_v48 }
  0xe6   : > { %1104 = vrcp.f32 %v702_v49 }
  0xef   : > { %v1103_v50 = vpop.eup %1102 }
  0xf0   : > { %v1105_v52 = vpop.eup %1104  ;;  %v704_v53 = vmul.f32 %v1103_v50, %v1099_v24 }
  0xf1   : > { %v706_v54 = vmul.f32 %v1105_v52, %v1101_v35 }
  0xf2   : > { %v751_v56 = vrot.slane %v704_v53, %v1398_v31  ;;  %v719_v57 = vrot.slane %v704_v53, %v1388_v26  ;;  %v734_v58 = vrot.slane %v704_v53, %v1392_v28  ;;  %v768_v0 = vrot.slane %v704_v53, %v1402_v33 }
  0xf3   : > { %v755_v59 = vrot.slane %v706_v54, %v1398_v31  ;;  %v723_v60 = vrot.slane %v706_v54, %v1388_v26  ;;  %v738_v61 = vrot.slane %v706_v54, %v1392_v28  ;;  %v772_v4 = vrot.slane %v706_v54, %v1402_v33 }
  0xf4   : > { %v724_v62 = vmul.f32 %v719_v57, %v714_v51  ;;  %v739_v63 = vmul.f32 %v734_v58, %v729_v55  ;;  %v756_v5 = vmul.f32 %v751_v56, %v746_v1  ;;  %v773_v11 = vmul.f32 %v768_v0, %v763_v9  ;;  %v862_v57 = vpop.permute.xlu0 %861 }
  0xf5   : > { %v725_v2 = vmul.f32 %v723_v60, %v714_v51  ;;  %v740_v3 = vmul.f32 %v738_v61, %v729_v55  ;;  %v757_v7 = vmul.f32 %v755_v59, %v746_v1  ;;  %v774_v13 = vmul.f32 %v772_v4, %v763_v9  ;;  %v889_v60 = vpop.permute.xlu1 %888 }
  0xf6   : > { %v741_v6 = vadd.f32 %v739_v63, %v724_v62 }
  0xf7   : > { %v742_v8 = vadd.f32 %v740_v3, %v725_v2 }
  0xf8   : > { %v758_v10 = vadd.f32 %v756_v5, %v741_v6  ;;  %v917_v1 = vpop.permute.xlu0 %916 }
  0xf9   : > { %v759_v12 = vadd.f32 %v757_v7, %v742_v8 }
  0xfa   : > { %v775_v14 = vadd.f32 %v773_v11, %v758_v10 }
  0xfb   : > { %v776_v16 = vadd.f32 %v774_v13, %v759_v12 }
  0xfc   : > { %v783_v17 = vadd.f32 %v781_v15, %v775_v14 }
  0xfd   : > { %v784_v18 = vadd.f32 %v781_v15, %v776_v16 }
  0xfe   : > { %v785_v19 = vsub.f32 0.0, %v783_v17 }
  0xff   : > { %v786_v20 = vsub.f32 0.0, %v784_v18 }
 0x100   : > { %v787_v21 = vmul.f32 1.442695, %v785_v19 }
 0x101   : > { %v789_v22 = vmul.f32 1.442695, %v786_v20 }
 0x102   : > { %1106 = vpow2.f32 %v787_v21 }
 0x103   : > { %1108 = vpow2.f32 %v789_v22 }
 0x10c   : > { %v1107_v23 = vpop.eup %1106 }
 0x10d   : > { %v1109_v24 = vpop.eup %1108  ;;  %v791_v35 = vadd.f32 1.0, %v1107_v23 }
 0x10e   : > { %v792_v36 = vadd.f32 1.0, %v1109_v24 }
 0x10f   : > { %1110 = vrcp.f32 %v791_v35 }
 0x110   : > { %1112 = vrcp.f32 %v792_v36 }
 0x119   : > { %v1111_v37 = vpop.eup %1110 }
 0x11a   : > { %v1113_v38 = vpop.eup %1112 }
 0x11b   : > { %v803_v39 = vcombine.low %v1111_v37, %v1113_v38 }
 0x11d   : > { %v805_v40 = vmul.f32 %v803_v39, %v1395_v30 }
 0x11f   : > { %v840_v42 = vrot.slane %v805_v40, %v1392_v28  ;;  %v844_v43 = vrot.slane %v805_v40, %v458_v29  ;;  %v815_v44 = vrot.slane %v805_v40, %v1388_v26  ;;  %v819_v45 = vrot.slane %v805_v40, %v433_v27 }
 0x120   : > { %v894_v47 = vrot.slane %v805_v40, %v1402_v33  ;;  %v898_v48 = vrot.slane %v805_v40, %v512_v34  ;;  %v867_v30 = vrot.slane %v805_v40, %v1398_v31  ;;  %v871_v49 = vrot.slane %v805_v40, %v485_v32 }
 0x121   : > { %v850_v50 = vrot.slane %v840_v42, %v1392_v28  ;;  %v854_v29 = vrot.slane %v844_v43, %v1392_v28  ;;  %v825_v51 = vrot.slane %v815_v44, %v1388_v26  ;;  %v829_v27 = vrot.slane %v819_v45, %v1388_v26 }
 0x122   : > { %v904_v52 = vrot.slane %v894_v47, %v1402_v33  ;;  %v908_v53 = vrot.slane %v898_v48, %v1402_v33  ;;  %v877_v34 = vrot.slane %v867_v30, %v1398_v31  ;;  %v881_v54 = vrot.slane %v871_v49, %v1398_v31 }
 0x123   : > { %v855_v55 = vmul.f32 %v850_v50, %v835_v46  ;;  %v856_v25 = vmul.f32 %v854_v29, %v835_v46  ;;  %v830_v32 = vmul.f32 %v825_v51, %v809_v41  ;;  %v831_v56 = vmul.f32 %v829_v27, %v809_v41 }
 0x124   : > { %v882_v59 = vmul.f32 %v877_v34, %v862_v57  ;;  %v883_v26 = vmul.f32 %v881_v54, %v862_v57  ;;  %v909_v61 = vmul.f32 %v904_v52, %v889_v60  ;;  %v910_v33 = vmul.f32 %v908_v53, %v889_v60 }
 0x125   : > { %v857_v28 = vadd.f32 %v855_v55, %v830_v32  ;;  %v858_v58 = vadd.f32 %v856_v25, %v831_v56 }
 0x127   : > { %v884_v62 = vadd.f32 %v882_v59, %v857_v28  ;;  %v885_v63 = vadd.f32 %v883_v26, %v858_v58 }
 0x129   : > { %v911_v0 = vadd.f32 %v909_v61, %v884_v62  ;;  %v912_v31 = vadd.f32 %v910_v33, %v885_v63 }
 0x12b   : > { %v919_v2 = vadd.f32 %v917_v1, %v911_v0  ;;  %v920_v3 = vadd.f32 %v917_v1, %v912_v31 }
 0x12d   : > { %vm921_vm5 = vcmp.ge.f32.partialorder %v919_v2, 0.0  ;;  %vm922_vm6 = vcmp.ge.f32.partialorder %v920_v3, 0.0  ;;  %v923_v4 = vmul.f32 0.01, %v919_v2  ;;  %v924_v5 = vmul.f32 0.01, %v920_v3 }
 0x12f   : > { %v925_v6 = vsel %vm921_vm5, %v919_v2, %v923_v4  ;;  %v926_v7 = vsel %vm922_vm6, %v920_v3, %v924_v5 }
 0x130   : > { %v929_v8 = vcombine.low %v925_v6, %v926_v7 }
 0x132   : > { %931 = vst [vmem:[%s404_s16] sm:$0xff] %v929_v8 }
 0x133   : > { %1127 = shalt.err (!%p1124_p5)
}
 0x134   : > { %s1128_s14 = scalar_lea.hbm %s1485_s28, 128  ;;  %s1132_s24 = scalar_lea.hbm %s1545_s11, 256 }
 0x135   : > { %p1129_p6 = scmp.ne.s32.totalorder %s1485_s28, %s1128_s14  ;;  %p1133_p10 = scmp.lt.u32.totalorder %s1485_s28, %s1545_s11 }
 0x136   : > { %p1134_p11 = scmp.lt.u32.totalorder %s1132_s24, %s1128_s14  ;;  %p1136_p13 = scmp.lt.u32.totalorder %s1128_s14, %s1485_s28 }
 0x137   : > { %p1130_p7 = pnand %p1129_p6, %p1296_p4 }
 0x138   : > { %p1135_p12 = por %p1134_p11, %p1133_p10 }
 0x139   : > { %p1131_p9 = pneg %p1130_p7 }
 0x13a   : > { %p1137_p0 = por %p1136_p13, %p1135_p12 }
 0x13c   : > { %p1138_p1 = pnand %p1137_p0, %p1131_p9 }
 0x13e   : > { %1141 = shalt.err (!%p1138_p1)
}
 0x13f   : > { %1040 = dma.vmem_to_hbm [thread:$0]  (%p1296_p4), %s1487_s23, 128, %s1485_s28, %s933_s20  }
 0x140 PF: > { %p1046_p2 = scmp.ge.s32.totalorder %s1192_s22, 2  ;;  %s961_s0 = sand.u32 1, %s1172_s17  }
 0x141   : > { %s962_s12 = scalar_lea.sflag [#allocation3], %s961_s0 }
 0x142   : > { %p1043_p3 = pnand %p1046_p2, %p1303_p8 }
 0x144   : > { %1167 = dma.done.wait (!%p1043_p3), %s962_s12, 128  }
 0x145   : > { %1169 = vsyncadd (!%p1043_p3), %s962_s12, 4294967168  ;;  %s24_s22 = sadd.s32 1, %s1192_s22   ;;  %s1552_s27 = sld [smem:[#allocation5_spill]] }
 0x146   : > { %p21_p5 = scmp.ge.s32.totalorder %s24_s22, 4   ;;  %s1553_s17 = smov %s1176_s18 }
 0x147   : > { %s1554_s18 = smov %s1180_s19  ;;  %s1555_s19 = smov %s1309_s30 }
 0x148   : > { %s1556_s20 = smov %s1188_s21  ;;  %23 = sbr.rel (!%p21_p5) target bundleno = 6 (0x6), region = 99 }
 0x14b   : > { %s1557_s21 = smov %s1552_s27 }
 0x14f   :  { %967 = vsyncpa [#allocation3], 1 }
 0x150   :  { %969 = vsyncpa [#allocation3 + $0x1], 1 }

</bundles_post_ra>
